<compile_context>
chip_gen: v5e
topology: v5e:2x2
jax: 0.10.0
libtpu: 0.0.40
codegen_flags: <defaults>
</compile_context>

<pallas_src>
import functools

import jax
import jax.numpy as jnp
from jax import lax
from jax.experimental import pallas as pl
from jax.experimental.pallas import tpu as pltpu

EPS = 1e-6


def _norm_kernel(alpha_ref, bias_ref, x_ref, o_ref, *, eps, d_model):
    """Scalar-affine layer-norm over the last axis (torch.std semantics)."""
    x = x_ref[...].astype(jnp.float32)                        # (tile_rows, D)

    # Per-row reductions on the MXU (idle here) instead of XLU rotate-add
    # trees: row_sums = x @ ones.  One operand is exactly 1.0, so HIGHEST
    # precision (multi-pass bf16) reproduces the f32 sum essentially exactly.
    ones_col = jnp.ones((d_model, 8), dtype=jnp.float32)
    row_sum = jnp.dot(x, ones_col,
                      preferred_element_type=jnp.float32,
                      precision=lax.Precision.HIGHEST)[:, :1]  # (tile_rows, 1)
    mean = row_sum * jnp.float32(1.0 / d_model)

    diff = x - mean
    sq_sum = jnp.dot(diff * diff, ones_col,
                     preferred_element_type=jnp.float32,
                     precision=lax.Precision.HIGHEST)[:, :1]   # (tile_rows, 1)
    # torch.std default: unbiased estimator (divide by N-1).
    var = sq_sum * jnp.float32(1.0 / max(d_model - 1, 1))
    std = jnp.sqrt(var)

    # Fold alpha and the divide into one per-row scale.  Approx reciprocal on
    # the EUP slot + one Newton refinement step (~2^-24 relative error) keeps
    # the narrow (tile_rows, 1) stats column off the VALU divide path.
    denom = std + jnp.float32(eps)
    r = pl.reciprocal(denom, approx=True)
    r = r * (jnp.float32(2.0) - denom * r)
    scale = alpha_ref[0] * r                                   # (tile_rows, 1)

    o_ref[...] = (diff * scale + bias_ref[0]).astype(o_ref.dtype)


def _choose_tile_rows(rows, d_model, itemsize, target_block_bytes, sublane,
                      min_grid=2):
    """Largest sublane-multiple row tile ~target_block_bytes, with >=min_grid
    grid steps so v7x's two TensorCores both get work."""
    bytes_per_row = d_model * itemsize
    tr = max(sublane, (target_block_bytes // bytes_per_row) // sublane * sublane)
    per_core = -(-rows // min_grid)                    # ceil(rows / min_grid)
    per_core_up = -(-per_core // sublane) * sublane    # round up to sublane
    return int(max(sublane, min(tr, per_core_up)))


def normalization_layer(x2d, alpha, bias, *, eps=EPS,
                        target_block_bytes=6 << 20):
    """x2d: (rows, d_model); alpha/bias: shape-(1,) float32 scalars."""
    rows, d_model = x2d.shape
    itemsize = jnp.dtype(x2d.dtype).itemsize
    sublane = 8 if itemsize >= 4 else 16               # bf16 packs 16 sublanes

    tile_rows = _choose_tile_rows(rows, d_model, itemsize,
                                  target_block_bytes, sublane)
    grid = (pl.cdiv(rows, tile_rows),)                 # partial tail is masked

    block_bytes = tile_rows * d_model * itemsize
    # Double-buffered in + out (4x block) plus the materialized f32 `diff`
    # intermediate and headroom.  Cap below v7x's 64 MiB physical VMEM;
    # 32 MiB floor is safe on v5e/v6e/v7x.
    vmem_limit = int(min(max(6 * block_bytes + (4 << 20), 32 << 20), 56 << 20))

    kernel = functools.partial(_norm_kernel, eps=eps, d_model=d_model)
    return pl.pallas_call(
        kernel,
        out_shape=jax.ShapeDtypeStruct((rows, d_model), x2d.dtype),
        grid_spec=pltpu.PrefetchScalarGridSpec(
            num_scalar_prefetch=2,                     # Alpha, Bias -> SMEM once
            grid=grid,
            in_specs=[
                pl.BlockSpec((tile_rows, d_model), lambda i, a, b: (i, 0)),
            ],
            out_specs=pl.BlockSpec((tile_rows, d_model), lambda i, a, b: (i, 0)),
        ),
        compiler_params=pltpu.CompilerParams(
            dimension_semantics=("parallel",),         # shard rows across TCs
            vmem_limit_bytes=vmem_limit),
    )(alpha, bias, x2d)


class NormalizationLayerPallas:
    """JAX/Pallas port of the PyTorch NormalizationLayer."""

    def __init__(self, eps: float = EPS):
        self.eps = eps
        # nn.Parameter(torch.ones(1)) for both Alpha and Bias.
        self.alpha = jnp.ones((1,), dtype=jnp.float32)
        self.bias = jnp.ones((1,), dtype=jnp.float32)

    def __call__(self, x):
        lead = x.shape[:-1]
        d_model = x.shape[-1]
        rows = 1
        for s in lead:
            rows *= s
        x2d = x.reshape(rows, d_model)
        out2d = normalization_layer(x2d, self.alpha, self.bias, eps=self.eps)
        return out2d.reshape(*lead, d_model)


def _reference_norm(x, alpha, bias, eps=EPS):
    mean = jnp.mean(x, axis=-1, keepdims=True)
    # unbiased std, matching torch.std default
    var = jnp.sum((x - mean) ** 2, axis=-1, keepdims=True) / (x.shape[-1] - 1)
    std = jnp.sqrt(var)
    return alpha * (x - mean) / (std + eps) + bias


if __name__ == "__main__":
    key = jax.random.PRNGKey(0)
    batch, seq, d_model = 2, 8, 128   # lane-dense last dim (multiple of 128)
    x = jax.random.normal(key, (batch, seq, d_model), dtype=jnp.float32)

    layer = NormalizationLayerPallas()
    out = layer(x)
    jax.block_until_ready(out)

    ref = _reference_norm(x, 1.0, 1.0)
    assert out.shape == x.shape
    assert jnp.max(jnp.abs(out - ref)) < 1e-4

    # Ragged path: rows not a multiple of the tile; handled via cdiv grid and
    # masked partial final block (no pad / slice passes).
    x2 = jax.random.normal(jax.random.PRNGKey(1), (3, 5, d_model),
                           dtype=jnp.float32)
    out2 = layer(x2)
    jax.block_until_ready(out2)
    assert jnp.max(jnp.abs(out2 - _reference_norm(x2, 1.0, 1.0))) < 1e-4

    print("KERNEL_OK")
</pallas_src>

<mosaic_0001>
module attributes {stable_mosaic.version = 11 : i64} {
  func.func @_norm_kernel(%arg0: i32, %arg1: memref<1xf32, #tpu.memory_space<smem>>, %arg2: memref<1xf32, #tpu.memory_space<smem>>, %arg3: memref<8x128xf32, #tpu.memory_space<vmem>>, %arg4: memref<8x128xf32, #tpu.memory_space<vmem>>) attributes {dimension_semantics = [#tpu.dimension_semantics<parallel>], iteration_bounds = array<i64: 2>, scalar_prefetch = 2 : i64, scratch_operands = 0 : i64, tpu.core_type = #tpu.core_type<tc>, window_params = [{transform_indices = @transform_0, window_bounds = array<i64: 8, 128>}, {transform_indices = @transform_1, window_bounds = array<i64: 8, 128>}]} {
    %c0 = arith.constant 0 : index
    %c0_0 = arith.constant 0 : index
    %0 = vector.load %arg3[%c0, %c0_0] : memref<8x128xf32, #tpu.memory_space<vmem>>, vector<8x128xf32>
    %cst = arith.constant 1.000000e+00 : f32
    %1 = vector.broadcast %cst : f32 to vector<128x8xf32>
    %cst_1 = arith.constant dense<0.000000e+00> : vector<8x8xf32>
    %2 = tpu.matmul %0, %1, %cst_1 {dimension_numbers = #tpu.dot_dimension_numbers<[1], [0], [0], [1], [0, 0, 1, 1], [], []>, precision = #tpu.contract_precision<fp32>} : vector<8x128xf32>, vector<128x8xf32>, vector<8x8xf32> -> vector<8x8xf32>
    %3 = vector.extract_strided_slice %2 {offsets = [0, 0], sizes = [8, 1], strides = [1, 1]} : vector<8x8xf32> to vector<8x1xf32>
    %cst_2 = arith.constant 7.812500e-03 : f32
    %4 = vector.broadcast %cst_2 : f32 to vector<8x1xf32>
    %5 = arith.mulf %3, %4 : vector<8x1xf32>
    %6 = vector.broadcast %5 : vector<8x1xf32> to vector<8x128xf32>
    %7 = arith.subf %0, %6 : vector<8x128xf32>
    %8 = arith.mulf %7, %7 : vector<8x128xf32>
    %cst_3 = arith.constant dense<0.000000e+00> : vector<8x8xf32>
    %9 = tpu.matmul %8, %1, %cst_3 {dimension_numbers = #tpu.dot_dimension_numbers<[1], [0], [0], [1], [0, 0, 1, 1], [], []>, precision = #tpu.contract_precision<fp32>} : vector<8x128xf32>, vector<128x8xf32>, vector<8x8xf32> -> vector<8x8xf32>
    %10 = vector.extract_strided_slice %9 {offsets = [0, 0], sizes = [8, 1], strides = [1, 1]} : vector<8x8xf32> to vector<8x1xf32>
    %cst_4 = arith.constant 0.00787401571 : f32
    %11 = vector.broadcast %cst_4 : f32 to vector<8x1xf32>
    %12 = arith.mulf %10, %11 : vector<8x1xf32>
    %13 = math.sqrt %12 : vector<8x1xf32>
    %cst_5 = arith.constant 9.99999997E-7 : f32
    %14 = vector.broadcast %cst_5 : f32 to vector<8x1xf32>
    %15 = arith.addf %13, %14 : vector<8x1xf32>
    %16 = tpu.reciprocal %15 {approx = true} : vector<8x1xf32> -> vector<8x1xf32>
    %17 = arith.mulf %15, %16 : vector<8x1xf32>
    %cst_6 = arith.constant 2.000000e+00 : f32
    %18 = vector.broadcast %cst_6 : f32 to vector<8x1xf32>
    %19 = arith.subf %18, %17 : vector<8x1xf32>
    %20 = arith.mulf %16, %19 : vector<8x1xf32>
    %c0_7 = arith.constant 0 : index
    %21 = memref.load %arg1[%c0_7] : memref<1xf32, #tpu.memory_space<smem>>
    %22 = vector.broadcast %21 : f32 to vector<8x1xf32>
    %23 = arith.mulf %22, %20 : vector<8x1xf32>
    %24 = vector.broadcast %23 : vector<8x1xf32> to vector<8x128xf32>
    %25 = arith.mulf %7, %24 : vector<8x128xf32>
    %c0_8 = arith.constant 0 : index
    %26 = memref.load %arg2[%c0_8] : memref<1xf32, #tpu.memory_space<smem>>
    %27 = vector.broadcast %26 : f32 to vector<8x128xf32>
    %28 = arith.addf %25, %27 : vector<8x128xf32>
    %c0_9 = arith.constant 0 : index
    %c0_10 = arith.constant 0 : index
    %29 = vector.load %arg4[%c0_9, %c0_10] : memref<8x128xf32, #tpu.memory_space<vmem>>, vector<8x128xf32>
    tpu.vector_store %arg4[%c0_9, %c0_10], %28 {strides = array<i32>} : memref<8x128xf32, #tpu.memory_space<vmem>>, vector<8x128xf32>,
    return
  }
  func.func @transform_0(%arg0: i32, %arg1: memref<1xf32, #tpu.memory_space<smem>>, %arg2: memref<1xf32, #tpu.memory_space<smem>>) -> (i32, i32) {
    %c0_i32 = arith.constant 0 : i32
    %c0_i32_0 = arith.constant 0 : i32
    return %arg0, %c0_i32 : i32, i32
  }
  func.func @transform_1(%arg0: i32, %arg1: memref<1xf32, #tpu.memory_space<smem>>, %arg2: memref<1xf32, #tpu.memory_space<smem>>) -> (i32, i32) {
    %c0_i32 = arith.constant 0 : i32
    %c0_i32_0 = arith.constant 0 : i32
    return %arg0, %c0_i32 : i32, i32
  }
}

</mosaic_0001>

<bundles_post_ra>
// kernel: tpu_custom_call.1
= control target key start
LH: loop header
LB: loop body
LE: loop exit
PB: predicated region body
PF: predicated region fallthrough
CT: control target
= control target key end

     0   :  { %s961_s0 = inlined_call_operand.<no memory space> [shape: f32[1], index: 0, kind: input, shape index: {}]   ;;  %s962_s1 = inlined_call_operand.<no memory space> [shape: f32[1], index: 1, kind: input, shape index: {}]   ;;  %s963_s2 = inlined_call_operand.hbm [shape: f32[16,128], index: 2, kind: input, shape index: {}]   ;;  %s964_s3 = inlined_call_operand.hbm [shape: f32[16,128], index: 3, kind: output, shape index: {}]  }
   0x1   :  { %8 = sst [smem:[#allocation3]] %s961_s0 }
   0x2   :  { %9 = sst [smem:[#allocation4]] %s962_s1 }
   0x3   :  { %10 = vsyncpa [#allocation6], 0 }
   0x4   :  { %12 = vsyncpa [#allocation6 + $0x1], 0 }
   0x5   :  { %13 = vsyncpa [#allocation7], 0 }
   0x6   :  { %15 = vsyncpa [#allocation7 + $0x1], 0  ;;  %s723_s16 = smov 0   ;;  %s725_s17 = smov 0  }
   0x7   :  { %s727_s18 = smov 0   ;;  %s729_s19 = smov 0  }
   0x8 LB: > { %s744_s0 = sadd.s32 4294967295, %s692_s19   ;;  %s530_s1 = sadd.s32 4294967294, %s692_s19   ;;  %s692_s19 = sphi %s729_s19, %s974_s19   ;;  %s688_s18 = sphi %s727_s18, %s973_s18   ;;  %s684_s17 = sphi %s725_s17, %s972_s17   ;;  %s680_s16 = sphi %s723_s16, %s971_s16  }
   0x9   : > { %s748_s20 = sadd.s32 1, %s692_s19   ;;  %s28_s21 = sadd.s32 1, %s688_s18 }
   0xa   : > { %s25_s22 = ssub.s32 %s692_s19, %s748_s20  ;;  %p35_p0 = scmp.ne.s32.totalorder %s688_s18, %s684_s17 }
   0xb   : > { %p26_p1 = scmp.eq.s32.totalorder %s25_s22, 0  ;;  %p36_p2 = scmp.eq.s32.totalorder %s692_s19, 0 }
   0xc   : > { %p41_p3 = scmp.ne.s32.totalorder %s684_s17, %s680_s16  ;;  %p42_p4 = scmp.eq.s32.totalorder %s744_s0, 0 }
   0xd   : > { %s760_s23 = scalar_select %p26_p1, %s688_s18, %s28_s21  }
   0xe   : > { %p762_p5 = por %p36_p2, %p35_p0  ;;  %p766_p6 = por %p42_p4, %p41_p3 }
   0xf   : > { %p65_p7 = scmp.eq.s32.totalorder %s744_s0, 1  ;;  %p71_p8 = scmp.eq.s32.totalorder %s530_s1, 1 }
  0x10   : > { %p554_p10 = scmp.lt.s32.totalorder %s692_s19, 2  ;;  %s91_s28 = sand.u32 1, %s688_s18  }
  0x11   : > { %p773_p11 = por %p65_p7, %p35_p0  ;;  %p777_p12 = por %p71_p8, %p41_p3 }
  0x12   : > { %s534_s29 = sshll.u32 %s692_s19, 3  ;;  %s533_s30 = sshll.u32 %s91_s28, 3 }
  0x13   : > { %s99_s6 = scalar_lea.hbm %s963_s2, %s534_s29  ;;  %s95_s8 = scalar_lea.vmem [#allocation5], %s533_s30 }
  0x14   : > { %s101_s7 = sshll.u32 %s99_s6, 4  ;;  %s103_s9 = sshll.u32 %s95_s8, 4  ;;  %s102_s7 = int_to_ptr.hbm [resolvable:$true] %s101_s7  ;;  %s104_s9 = int_to_ptr.vmem [resolvable:$true] %s103_s9 }
  0x15   : > { %p788_p13 = pnand %p554_p10, %p762_p5  ;;  %p535_p0 = scmp.ge.s32.totalorder %s692_s19, 1 }
  0x16   : > { %p108_p1 = scmp.lt.s32.totalorder %s692_s19, 3  ;;  %s92_s11 = scalar_lea.sflag [#allocation6], %s91_s28 }
  0x17   : > { %s596_s12 = sshra.s32 %s102_s7, 4  ;;  %p600_p3 = pneg %p788_p13  ;;  %s597_s12 = int_to_ptr.hbm [resolvable:$true] %s596_s12 }
  0x18   : > { %s598_s13 = scalar_lea.hbm %s597_s12, 8  ;;  %s603_s1 = scalar_lea.hbm %s963_s2, 16 }
  0x19   : > { %p599_p2 = scmp.ne.s32.totalorder %s597_s12, %s598_s13  ;;  %p604_p5 = scmp.lt.s32.totalorder %s597_s12, %s963_s2 }
  0x1a   : > { %p605_p8 = scmp.lt.s32.totalorder %s603_s1, %s598_s13 }
  0x1b   : > { %p601_p4 = pnand %p600_p3, %p599_p2 }
  0x1c   : > { %p606_p10 = por %p605_p8, %p604_p5 }
  0x1d   : > { %p602_p7 = pneg %p601_p4 }
  0x1f   : > { %p607_p9 = pnand %p606_p10, %p602_p7 }
  0x21   : > { %610 = shalt.err (!%p607_p9)
}
  0x22   : > { %549 = dma.hbm_to_vmem [thread:$0]  (!%p788_p13), %s102_s7, 128, %s104_s9, %s92_s11  }
  0x23   : > { %p109_p2 = pnand %p535_p0, %p108_p1 }
  0x24   : > { %s809_s24 = sand.u32 (!%p109_p2), 1, %s684_s17  }
  0x25   : > { %112 = sbr.rel (%p109_p2) target bundleno = 652 (0x28c), region = 24  ;;  %s536_s28 = sshll.u32 (!%p109_p2), %s809_s24, 3 }
  0x26   : > { %s115_s29 = scalar_lea.sflag (!%p109_p2), [#allocation6], %s809_s24  ;;  %s118_s30 = scalar_lea.vmem (!%p109_p2), [#allocation5], %s536_s28 }
  0x2a   : > { %671 = dma.done.wait (%p766_p6), %s115_s29, 128  }
  0x2b   : > { %673 = vsyncadd (%p766_p6), %s115_s29, 4294967168  ;;  %v694_v0 = vmov 1.0   ;;  %v695_v1 = vmov 0.0   ;;  %v832_v2 = vld [vmem:[%s118_s30] sm:$0xff]  ;;  %v696_v8 = vmov 0   ;;  %s431_s25 = sld [smem:[#allocation3]] }
  0x2c   : > { %139 = vmatpush.msra.mxu0 %v694_v0  ;;  %207 = vmatpush.msra.mxu3 %v694_v0  ;;  %v155_v3 = vand.u32 4294901760, %v832_v2  ;;  %s440_s4 = sld [smem:[#allocation4]]  ;;  %s539_s5 = sshll.u32 %s744_s0, 3 }
  0x2d   : > { %251 = vmatpush.msra.mxu2 %v694_v0  ;;  %179 = vmatpush.msra.mxu1 %v695_v1  ;;  %s455_s8 = scalar_lea.hbm %s964_s3, %s539_s5  ;;  %s137_s9 = scalar_lea.vmem [#allocation8], %s536_s28 }
  0x2e   : > { %140 = vmatpush.msra.mxu0 %v694_v0  ;;  %208 = vmatpush.msra.mxu3 %v694_v0  ;;  %v156_v4 = vsub.f32 %v832_v2, %v155_v3  ;;  %s457_s10 = sshll.u32 %s137_s9, 4  ;;  %s459_s11 = sshll.u32 %s455_s8, 4  ;;  %s458_s10 = int_to_ptr.vmem [resolvable:$true] %s457_s10  ;;  %s460_s11 = int_to_ptr.hbm [resolvable:$true] %s459_s11 }
  0x2f   : > { %252 = vmatpush.msra.mxu2 %v694_v0  ;;  %245 = vmatpush.msrb.mxu1 %v695_v1  ;;  %s445_s12 = scalar_lea.sflag [#allocation7], %s809_s24  ;;  %s640_s13 = sshra.s32 %s460_s11, 4  ;;  %s641_s13 = int_to_ptr.hbm [resolvable:$true] %s640_s13 }
  0x30   : > { %141 = vmatpush.msra.mxu0 %v694_v0  ;;  %209 = vmatpush.msra.mxu3 %v694_v0  ;;  %v157_v5 = vand.u32 4294901760, %v156_v4  ;;  %s642_s0 = scalar_lea.hbm %s641_s13, 8  ;;  %s646_s1 = scalar_lea.hbm %s964_s3, 16 }
  0x31   : > { %253 = vmatpush.msra.mxu2 %v694_v0  ;;  %181 = vmatmul.f32.vlgmr.msra.gmra.mxu1 %v155_v3  ;;  %v432_v55 = vstv %s431_s25  ;;  %p643_p6 = scmp.ne.s32.totalorder %s641_s13, %s642_s0  ;;  %p647_p0 = scmp.lt.s32.totalorder %s641_s13, %s964_s3 }
  0x32   : > { %142 = vmatpush.msra.mxu0 %v694_v0  ;;  %210 = vmatpush.msra.mxu3 %v694_v0  ;;  %v158_v6 = vsub.f32 %v156_v4, %v157_v5  ;;  %v441_v58 = vstv %s440_s4  ;;  %p648_p1 = scmp.lt.s32.totalorder %s646_s1, %s642_s0 }
  0x33   : > { %254 = vmatpush.msra.mxu2 %v694_v0  ;;  %280 = vmatpush.msra.mxu1 %v694_v0  ;;  %p644_p9 = pnand %p643_p6, %p773_p11 }
  0x34   : > { %143 = vmatpush.msra.mxu0 %v694_v0  ;;  %211 = vmatpush.msra.mxu3 %v694_v0  ;;  %v159_v7 = vand.u32 4294901760, %v158_v6  ;;  %p649_p3 = por %p648_p1, %p647_p0 }
  0x35   : > { %255 = vmatpush.msra.mxu2 %v694_v0  ;;  %281 = vmatpush.msra.mxu1 %v694_v0  ;;  %p645_p13 = pneg %p644_p9 }
  0x36   : > { %144 = vmatpush.msra.mxu0 %v694_v0  ;;  %212 = vmatpush.msra.mxu3 %v694_v0 }
  0x37   : > { %256 = vmatpush.msra.mxu2 %v694_v0  ;;  %282 = vmatpush.msra.mxu1 %v694_v0  ;;  %p650_p4 = pnand %p649_p3, %p645_p13 }
  0x38   : > { %145 = vmatpush.msra.mxu0 %v694_v0  ;;  %213 = vmatpush.msra.mxu3 %v694_v0 }
  0x39   : > { %257 = vmatpush.msra.mxu2 %v694_v0  ;;  %247 = vmatmul.f32.vlgmr.msrb.gmra.mxu1 %v155_v3 }
  0x3a   : > { %146 = vmatpush.msra.mxu0 %v694_v0  ;;  %214 = vmatpush.msra.mxu3 %v694_v0 }
  0x3b   : > { %258 = vmatpush.msra.mxu2 %v694_v0  ;;  %283 = vmatpush.msra.mxu1 %v694_v0 }
  0x3c   : > { %147 = vmatpush.msra.mxu0 %v694_v0  ;;  %215 = vmatpush.msra.mxu3 %v694_v0 }
  0x3d   : > { %259 = vmatpush.msra.mxu2 %v694_v0  ;;  %284 = vmatpush.msra.mxu1 %v694_v0 }
  0x3e   : > { %148 = vmatpush.msra.mxu0 %v694_v0  ;;  %216 = vmatpush.msra.mxu3 %v694_v0 }
  0x3f   : > { %260 = vmatpush.msra.mxu2 %v694_v0  ;;  %285 = vmatpush.msra.mxu1 %v694_v0 }
  0x40   : > { %149 = vmatpush.msra.mxu0 %v694_v0  ;;  %217 = vmatpush.msra.mxu3 %v694_v0 }
  0x41   : > { %261 = vmatpush.msra.mxu2 %v694_v0  ;;  %286 = vmatpush.msra.mxu1 %v694_v0 }
  0x42   : > { %150 = vmatpush.msra.mxu0 %v694_v0  ;;  %218 = vmatpush.msra.mxu3 %v694_v0 }
  0x43   : > { %262 = vmatpush.msra.mxu2 %v694_v0  ;;  %287 = vmatpush.msra.mxu1 %v694_v0 }
  0x44   : > { %151 = vmatpush.msra.mxu0 %v694_v0  ;;  %219 = vmatpush.msra.mxu3 %v694_v0 }
  0x45   : > { %263 = vmatpush.msra.mxu2 %v694_v0  ;;  %288 = vmatpush.msra.mxu1 %v694_v0 }
  0x46   : > { %152 = vmatpush.msra.mxu0 %v694_v0  ;;  %220 = vmatpush.msra.mxu3 %v694_v0 }
  0x47   : > { %264 = vmatpush.msra.mxu2 %v694_v0  ;;  %289 = vmatpush.msra.mxu1 %v694_v0 }
  0x48   : > { %153 = vmatpush.msra.mxu0 %v694_v0  ;;  %221 = vmatpush.msra.mxu3 %v694_v0 }
  0x49   : > { %265 = vmatpush.msra.mxu2 %v694_v0  ;;  %290 = vmatpush.msra.mxu1 %v694_v0 }
  0x4a   : > { %154 = vmatpush.msra.mxu0 %v694_v0  ;;  %222 = vmatpush.msra.mxu3 %v694_v0 }
  0x4b   : > { %160 = vmatmul.f32.vlgmr.msra.gmra.mxu0 %v159_v7  ;;  %226 = vmatmul.f32.vlgmr.msra.gmra.mxu3 %v157_v5 }
  0x4c   : > { %200 = vmatpush.msrb.mxu0 %v695_v1  ;;  %266 = vmatpush.msra.mxu2 %v694_v0 }
  0x4d   : > { %268 = vmatmul.f32.vlgmr.msra.gmra.mxu2 %v155_v3  ;;  %392 = vmatpush.msrb.mxu3 %v694_v0 }
  0x4e   : > { %348 = vmatpush.msrb.mxu2 %v694_v0  ;;  %320 = vmatpush.msra.mxu0 %v695_v1 }
  0x4f   : > { %393 = vmatpush.msrb.mxu3 %v694_v0  ;;  %291 = vmatpush.msra.mxu1 %v694_v0 }
  0x50   : > { %349 = vmatpush.msrb.mxu2 %v694_v0  ;;  %591 = vset.pattern.permute.xlu0 %v696_v8 }
  0x51   : > { %394 = vmatpush.msrb.mxu3 %v694_v0  ;;  %292 = vmatpush.msra.mxu1 %v694_v0 }
  0x52   : > { %350 = vmatpush.msrb.mxu2 %v694_v0 }
  0x53   : > { %203 = vmatmul.f32.vlgmr.msrb.gmra.mxu0 %v156_v4  ;;  %395 = vmatpush.msrb.mxu3 %v694_v0 }
  0x54   : > { %351 = vmatpush.msrb.mxu2 %v694_v0  ;;  %386 = vmatpush.msrb.mxu0 %v695_v1 }
  0x55   : > { %396 = vmatpush.msrb.mxu3 %v694_v0  ;;  %293 = vmatpush.msra.mxu1 %v694_v0 }
  0x56   : > { %352 = vmatpush.msrb.mxu2 %v694_v0 }
  0x57   : > { %397 = vmatpush.msrb.mxu3 %v694_v0  ;;  %294 = vmatpush.msra.mxu1 %v694_v0 }
  0x58   : > { %353 = vmatpush.msrb.mxu2 %v694_v0 }
  0x59   : > { %398 = vmatpush.msrb.mxu3 %v694_v0  ;;  %295 = vmatpush.msra.mxu1 %v694_v0 }
  0x5a   : > { %354 = vmatpush.msrb.mxu2 %v694_v0 }
  0x5b   : > { %399 = vmatpush.msrb.mxu3 %v694_v0  ;;  %341 = vmatpush.msrb.mxu1 %v695_v1 }
  0x5c   : > { %355 = vmatpush.msrb.mxu2 %v694_v0 }
  0x5d   : > { %400 = vmatpush.msrb.mxu3 %v694_v0 }
  0x5e   : > { %356 = vmatpush.msrb.mxu2 %v694_v0 }
  0x5f   : > { %401 = vmatpush.msrb.mxu3 %v694_v0 }
  0x60   : > { %357 = vmatpush.msrb.mxu2 %v694_v0 }
  0x61   : > { %402 = vmatpush.msrb.mxu3 %v694_v0 }
  0x62   : > { %358 = vmatpush.msrb.mxu2 %v694_v0 }
  0x63   : > { %403 = vmatpush.msrb.mxu3 %v694_v0 }
  0x64   : > { %359 = vmatpush.msrb.mxu2 %v694_v0 }
  0x65   : > { %404 = vmatpush.msrb.mxu3 %v694_v0 }
  0x66   : > { %360 = vmatpush.msrb.mxu2 %v694_v0 }
  0x67   : > { %405 = vmatpush.msrb.mxu3 %v694_v0 }
  0x68   : > { %361 = vmatpush.msrb.mxu2 %v694_v0 }
  0x69   : > { %406 = vmatpush.msrb.mxu3 %v694_v0 }
  0x6a   : > { %362 = vmatpush.msrb.mxu2 %v694_v0 }
  0x6b   : > { %407 = vmatpush.msrb.mxu3 %v694_v0 }
  0x6c   : > { %363 = vmatpush.msrb.mxu2 %v694_v0 }
  0xae   : > { %v182_v10 = vpop.f32.mrf.mxu1 }
  0xb6   : > { %v248_v15 = vpop.f32.mrf.mxu1 }
  0xc8   : > { %v161_v9 = vpop.f32.mrf.mxu0 }
  0xc9   : > { %v183_v11 = vadd.f32 %v182_v10, %v161_v9 }
  0xce   : > { %v227_v13 = vpop.f32.mrf.mxu3 }
  0xd0   : > { %v204_v12 = vpop.f32.mrf.mxu0  ;;  %v269_v17 = vpop.f32.mrf.mxu2 }
  0xd1   : > { %v205_v14 = vadd.f32 %v204_v12, %v183_v11 }
  0xd3   : > { %v228_v16 = vadd.f32 %v227_v13, %v205_v14 }
  0xd5   : > { %v249_v18 = vadd.f32 %v248_v15, %v228_v16 }
  0xd7   : > { %v270_v19 = vadd.f32 %v269_v17, %v249_v18 }
  0xd9   : > { %v272_v20 = vmul.f32 0.0078125, %v270_v19 }
  0xdb   : > { %275 = vperm.xlu0 %591, %v272_v20  }
 0x14d   : > { %v276_v21 = vpop.permute.xlu0 %275 }
 0x14e   : > { %v278_v22 = vsub.f32 %v832_v2, %v276_v21 }
 0x150   : > { %v279_v23 = vmul.f32 %v278_v22, %v278_v22 }
 0x152   : > { %v296_v24 = vand.u32 4294901760, %v279_v23 }
 0x154   : > { %v297_v25 = vsub.f32 %v279_v23, %v296_v24  ;;  %322 = vmatmul.f32.vlgmr.msra.gmra.mxu0 %v296_v24  ;;  %409 = vmatmul.f32.vlgmr.msrb.gmra.mxu3 %v296_v24 }
 0x156   : > { %v298_v26 = vand.u32 4294901760, %v297_v25 }
 0x158   : > { %v299_v27 = vsub.f32 %v297_v25, %v298_v26  ;;  %367 = vmatmul.f32.vlgmr.msrb.gmra.mxu2 %v298_v26 }
 0x15a   : > { %v300_v28 = vand.u32 4294901760, %v299_v27 }
 0x15c   : > { %301 = vmatmul.f32.vlgmr.msra.gmra.mxu1 %v300_v28  ;;  %388 = vmatmul.f32.vlgmr.msrb.gmra.mxu0 %v296_v24 }
 0x164   : > { %344 = vmatmul.f32.vlgmr.msrb.gmra.mxu1 %v297_v25 }
 0x1d1   : > { %v323_v30 = vpop.f32.mrf.mxu0 }
 0x1d7   : > { %v410_v38 = vpop.f32.mrf.mxu3 }
 0x1d9   : > { %v302_v29 = vpop.f32.mrf.mxu1  ;;  %v389_v36 = vpop.f32.mrf.mxu0 }
 0x1da   : > { %v324_v31 = vadd.f32 %v323_v30, %v302_v29 }
 0x1db   : > { %v368_v34 = vpop.f32.mrf.mxu2 }
 0x1e1   : > { %v345_v32 = vpop.f32.mrf.mxu1 }
 0x1e2   : > { %v346_v33 = vadd.f32 %v345_v32, %v324_v31 }
 0x1e4   : > { %v369_v35 = vadd.f32 %v368_v34, %v346_v33 }
 0x1e6   : > { %v390_v37 = vadd.f32 %v389_v36, %v369_v35 }
 0x1e8   : > { %v411_v39 = vadd.f32 %v410_v38, %v390_v37 }
 0x1ea   : > { %v413_v40 = vmul.f32 0.007874016, %v411_v39 }
 0x1ec   : > { %592 = vrsqrt.f32 %v413_v40  ;;  %vm421_vm0 = vcmp.eq.f32.partialorder %v413_v40, inf  ;;  %v424_v48 = vand.u32 2147483648, %v413_v40  ;;  %vm423_vm1 = vcmp.eq.f32.partialorder %v413_v40, 0.0 }
 0x1f2   : > { %v593_v41 = vpop.eup %592 }
 0x1f3   : > { %v415_v42 = vmul.f32 %v593_v41, %v413_v40 }
 0x1f5   : > { %v416_v43 = vmul.f32 %v593_v41, %v415_v42 }
 0x1f7   : > { %v417_v44 = vmul.f32 0.5, %v416_v43 }
 0x1f9   : > { %v418_v45 = vsub.f32 1.5, %v417_v44 }
 0x1fb   : > { %v419_v46 = vmul.f32 %v593_v41, %v418_v45 }
 0x1fd   : > { %v420_v47 = vmul.f32 %v419_v46, %v413_v40 }
 0x1ff   : > { %v422_v49 = vsel %vm421_vm0, %v413_v40, %v420_v47 }
 0x200   : > { %v425_v50 = vsel %vm423_vm1, %v424_v48, %v422_v49 }
 0x201   : > { %v426_v51 = vadd.f32 1e-06, %v425_v50 }
 0x203   : > { %594 = vrcp.f32 %v426_v51 }
 0x209   : > { %v595_v52 = vpop.eup %594 }
 0x20a   : > { %v428_v53 = vmul.f32 %v595_v52, %v426_v51 }
 0x20c   : > { %v429_v54 = vsub.f32 2.0, %v428_v53 }
 0x20e   : > { %v430_v56 = vmul.f32 %v595_v52, %v429_v54 }
 0x210   : > { %v433_v57 = vmul.f32 %v432_v55, %v430_v56 }
 0x212   : > { %436 = vperm.xlu0 %591, %v433_v57  }
 0x284   : > { %v437_v59 = vpop.permute.xlu0 %436 }
 0x285   : > { %v439_v60 = vmul.f32 %v437_v59, %v278_v22 }
 0x287   : > { %v442_v61 = vadd.f32 %v441_v58, %v439_v60 }
 0x289   : > { %443 = vst [vmem:[%s137_s9] sm:$0xff] %v442_v61 }
 0x28a   : > { %653 = shalt.err (!%p650_p4)
}
 0x28b   : > { %544 = dma.vmem_to_hbm [thread:$0]  (%p773_p11), %s458_s10, 128, %s460_s11, %s445_s12  }
 0x28c PF: > { %s471_s24 = sand.u32 1, %s680_s16   ;;  %p970_p7 = scmp.ge.s32.totalorder %s692_s19, 2 }
 0x28d   : > { %s472_s28 = scalar_lea.sflag [#allocation7], %s471_s24 }
 0x28e   : > { %p551_p5 = pnand %p970_p7, %p777_p12 }
 0x290   : > { %p552_p8 = pneg %p551_p5 }
 0x292   : > { %675 = dma.done.wait (%p552_p8), %s472_s28, 128  }
 0x293   : > { %677 = vsyncadd (%p552_p8), %s472_s28, 4294967168  ;;  %p18_p10 = scmp.ge.s32.totalorder %s748_s20, 4   ;;  %s971_s16 = smov %s684_s17 }
 0x294   : > { %s972_s17 = smov %s688_s18  ;;  %s973_s18 = smov %s760_s23 }
 0x295   : > { %s974_s19 = smov %s748_s20  ;;  %20 = sbr.rel (!%p18_p10) target bundleno = 8 (0x8), region = 69 }
 0x29a   :  { %478 = vsyncpa [#allocation6], 1 }
 0x29b   :  { %480 = vsyncpa [#allocation6 + $0x1], 1 }
 0x29c   :  { %481 = vsyncpa [#allocation7], 1 }
 0x29d   :  { %483 = vsyncpa [#allocation7 + $0x1], 1 }

</bundles_post_ra>
